<compile_context>
chip_gen: v7x
topology: tpu7x:2x2x1
jax: 0.10.0
libtpu: 0.0.40
codegen_flags: <defaults>
</compile_context>

<pallas_src>
import functools

import jax
import jax.numpy as jnp
from jax import lax
from jax.experimental import pallas as pl
from jax.experimental.pallas import tpu as pltpu


def _sym_sgcn_kernel(w_ref, x_ref, wl_ref, bl_ref, wh_ref, bh_ref, out_ref,
                     *, K, N, GPC, F, H, C, OUT_PAD):
    # --- NewSGConv.norm: Ahat = D^-1/2 W D^-1/2, deg = sum_j |W_ij|.
    #     W is symmetric so deg_c duplicates deg_r; the axis=0 reduction is kept
    #     (instead of a sublane->lane transpose of dis_r) because it lowers
    #     unconditionally and is negligible at these N. ---
    w = w_ref[...]                                       # (N, N), diag = self loops
    abs_w = jnp.abs(w)
    deg_r = jnp.sum(abs_w, axis=1, keepdims=True)        # (N, 1)
    deg_c = jnp.sum(abs_w, axis=0, keepdims=True)        # (1, N) == deg_r.T (symmetric)
    dis_r = jnp.where(deg_r > 0, lax.rsqrt(deg_r), 0.0)  # deg^-0.5 with inf -> 0
    dis_c = jnp.where(deg_c > 0, lax.rsqrt(deg_c), 0.0)
    a_norm = dis_r * w * dis_c                           # (N, N)

    # --- K propagation steps for ALL graphs of this chunk at once:
    #     one (N, N) x (N, GPC*F) matmul per step (graphs folded into lanes). ---
    h = x_ref[...]                                       # (N, GPC*F)
    for _ in range(K):                                   # K is a static Python int
        h = jnp.dot(a_norm, h, preferred_element_type=jnp.float32)

    # --- Restack graphs from lanes into sublanes: (N, GPC*F) -> (GPC*N, F),
    #     so SGConv's linear is ONE (GPC*N, F) x (F, H) MXU push. ---
    if GPC == 1:
        hs = h
    else:
        hs = jnp.concatenate([h[:, g * F:(g + 1) * F] for g in range(GPC)], axis=0)

    hs = jnp.dot(hs, wl_ref[...], preferred_element_type=jnp.float32) + bl_ref[...]
    hs = jnp.maximum(hs, 0.0)                            # (GPC*N, H)  (ReLU)

    # --- global_add_pool per graph: (GPC*N, H) -> (GPC, N, H) -> sum nodes. ---
    pooled = jnp.sum(hs.reshape(GPC, N, H), axis=1)      # (GPC, H)

    # --- Fused, lane-dense head: wh is pre-padded to 128 lanes as
    #     [W_fc | W_fc (dup) | W_dc | zeros]; bh likewise (dom bias pre-scaled
    #     by N in the wrapper).  Logits land in lanes [0:C], a duplicate copy
    #     in [C:2C] (softmaxed in place), dom in [2C:2C+2], zeros elsewhere.
    #     ReverseLayerF forward and eval-mode dropout are identities. ---
    slab = jnp.dot(pooled, wh_ref[...], preferred_element_type=jnp.float32) + bh_ref[...]

    lane = lax.broadcasted_iota(jnp.int32, (GPC, OUT_PAD), 1)
    pmask = (lane >= C) & (lane < 2 * C)                 # probas lanes
    m = jnp.max(jnp.where(pmask, slab, -jnp.inf), axis=-1, keepdims=True)
    e = jnp.where(pmask, jnp.exp(slab - m), 0.0)
    inv = pl.reciprocal(jnp.sum(e, axis=-1, keepdims=True), approx=True)  # EUP slot
    probas = e * inv

    # one unmasked lane-dense (GPC, 128) store: [logits | probas | dom | zeros]
    out_ref[...] = jnp.where(pmask, probas, slab)


def sym_sim_gcn_forward(x, w_sym, w_lin, b_lin, w_dc, b_dc, w_fc, b_fc, *, K=2):
    B, N, F = x.shape
    H = w_lin.shape[1]
    C = w_fc.shape[1]
    OUT_PAD = 128                        # lane-dense fused output width
    assert 2 * C + 2 <= OUT_PAD

    # Grid collapses to a single step unless the propagation work is large
    # enough that splitting across v7x's two TensorCores actually pays
    # (and the resulting blocks still satisfy the (8,128) constraint).
    # On single-TC v5e/v6e the small-shape path is always CHUNKS=1.
    work_macs = K * B * N * N * F
    CHUNKS = 2 if (work_macs > 1_000_000 and B % 2 == 0
                   and (B // 2) % 8 == 0 and N % 8 == 0) else 1
    GPC = B // CHUNKS                    # graphs per chunk

    # (B, N, F) -> (CHUNKS*N, GPC*F): graphs of a chunk side by side in lanes.
    x_ch = (x.reshape(CHUNKS, GPC, N, F)
             .transpose(0, 2, 1, 3)
             .reshape(CHUNKS * N, GPC * F))

    # Fused, pre-padded 128-lane head: [W_fc | W_fc dup | W_dc | zeros].
    # global_add_pool commutes with the linears, so dom = pooled @ W_dc + N*b_dc.
    w_head = jnp.zeros((H, OUT_PAD), jnp.float32)
    w_head = w_head.at[:, 0:C].set(w_fc)
    w_head = w_head.at[:, C:2 * C].set(w_fc)           # duplicate for in-place softmax
    w_head = w_head.at[:, 2 * C:2 * C + 2].set(w_dc)
    b_head = jnp.zeros((1, OUT_PAD), jnp.float32)
    b_head = b_head.at[:, 0:C].set(b_fc)
    b_head = b_head.at[:, C:2 * C].set(b_fc)
    b_head = b_head.at[:, 2 * C:2 * C + 2].set(float(N) * b_dc)

    kernel = functools.partial(_sym_sgcn_kernel, K=K, N=N, GPC=GPC, F=F, H=H,
                               C=C, OUT_PAD=OUT_PAD)

    grid_spec = pltpu.PrefetchScalarGridSpec(
        num_scalar_prefetch=0,
        grid=(CHUNKS,),
        in_specs=[
            pl.BlockSpec((N, N), lambda c: (0, 0)),                 # symmetric W
            pl.BlockSpec((N, GPC * F), lambda c: (c, 0)),           # features (chunk c)
            pl.BlockSpec((F, H), lambda c: (0, 0)),                 # SGConv lin W
            pl.BlockSpec((1, H), lambda c: (0, 0)),                 # SGConv lin b
            pl.BlockSpec((H, OUT_PAD), lambda c: (0, 0)),           # fused padded head W
            pl.BlockSpec((1, OUT_PAD), lambda c: (0, 0)),           # fused padded head b
        ],
        out_specs=pl.BlockSpec((GPC, OUT_PAD), lambda c: (c, 0)),   # fused output slab
    )

    out = pl.pallas_call(
        kernel,
        out_shape=jax.ShapeDtypeStruct((B, OUT_PAD), jnp.float32),
        grid_spec=grid_spec,
        compiler_params=pltpu.CompilerParams(dimension_semantics=("parallel",)),
    )(w_sym, x_ch, w_lin, b_lin, w_head, b_head)

    logits = out[:, :C]
    probas = out[:, C:2 * C]
    dom = out[:, 2 * C:2 * C + 2]
    return logits, probas, dom


def reference_forward(x, w_sym, w_lin, b_lin, w_dc, b_dc, w_fc, b_fc, K=2):
    """Plain-JAX reference mirroring the PyTorch forward (eval mode)."""
    abs_w = jnp.abs(w_sym)
    deg = abs_w.sum(axis=1)
    dis = jnp.where(deg > 0, deg ** -0.5, 0.0)
    a_norm = dis[:, None] * w_sym * dis[None, :]
    h = x
    for _ in range(K):
        h = jnp.einsum("ij,bjf->bif", a_norm, h)
    h = jnp.maximum(h @ w_lin + b_lin, 0.0)
    dom = (h @ w_dc + b_dc).sum(axis=1)
    pooled = h.sum(axis=1)
    logits = pooled @ w_fc + b_fc
    probas = jax.nn.softmax(logits, axis=1)
    return logits, probas, dom


if __name__ == "__main__":
    # Small shapes consistent with the module: a batch of 2 fully-connected graphs.
    B = 2              # batch_size (data.batch.max()+1)
    N = 16             # num_nodes per graph
    F = 8              # num_features
    H = 32             # num_hiddens
    C = 2              # num_classes
    K = 2              # SGConv propagation steps
    alpha = 1.0        # RevGrad alpha: only affects backward; forward is identity.

    key = jax.random.PRNGKey(0)
    k_ew, k_x, k_wl, k_bl, k_wd, k_bd, k_wf, k_bf = jax.random.split(key, 8)

    # Learnable lower-triangular edge weights -> dense symmetric matrix
    # (edge_weight + edge_weight.T - diag(diag)), exactly as in the module.
    xs, ys = jnp.tril_indices(N)
    ew_param = 0.1 * jax.random.normal(k_ew, (xs.shape[0],), dtype=jnp.float32)
    w_tri = jnp.zeros((N, N), jnp.float32).at[xs, ys].set(ew_param)
    w_sym = w_tri + w_tri.T - jnp.diag(jnp.diag(w_tri))

    # Deterministic parameter init (module __init__ shapes, stored as (in, out)).
    w_lin = 0.1 * jax.random.normal(k_wl, (F, H), dtype=jnp.float32)   # conv1.lin
    b_lin = 0.01 * jax.random.normal(k_bl, (1, H), dtype=jnp.float32)
    w_dc = 0.1 * jax.random.normal(k_wd, (H, 2), dtype=jnp.float32)    # domain_classifier
    b_dc = 0.01 * jax.random.normal(k_bd, (1, 2), dtype=jnp.float32)
    w_fc = 0.1 * jax.random.normal(k_wf, (H, C), dtype=jnp.float32)    # fc
    b_fc = 0.01 * jax.random.normal(k_bf, (1, C), dtype=jnp.float32)

    # data.x reshaped to (batch, num_nodes, num_features); data.batch is implicit.
    x = jax.random.normal(k_x, (B, N, F), dtype=jnp.float32)

    # TODO(synk): training-mode dropout not implemented (F.dropout with training=False
    # is identity); RevGrad only alters the backward pass (forward is identity).
    logits, probas, dom = sym_sim_gcn_forward(
        x, w_sym, w_lin, b_lin, w_dc, b_dc, w_fc, b_fc, K=K)
    jax.block_until_ready((logits, probas, dom))

    ref_logits, ref_probas, ref_dom = reference_forward(
        x, w_sym, w_lin, b_lin, w_dc, b_dc, w_fc, b_fc, K=K)

    assert logits.shape == (B, C) and probas.shape == (B, C) and dom.shape == (B, 2)
    assert jnp.allclose(logits, ref_logits, rtol=1e-3, atol=1e-3)
    assert jnp.allclose(probas, ref_probas, rtol=1e-3, atol=1e-3)
    assert jnp.allclose(dom, ref_dom, rtol=1e-3, atol=1e-3)

    print("KERNEL_OK")
</pallas_src>

<mosaic_0001>
module attributes {stable_mosaic.version = 11 : i64} {
  func.func @_sym_sgcn_kernel(%arg0: i32, %arg1: memref<16x16xf32, #tpu.memory_space<vmem>>, %arg2: memref<16x16xf32, #tpu.memory_space<vmem>>, %arg3: memref<8x32xf32, #tpu.memory_space<vmem>>, %arg4: memref<1x32xf32, #tpu.memory_space<vmem>>, %arg5: memref<32x128xf32, #tpu.memory_space<vmem>>, %arg6: memref<1x128xf32, #tpu.memory_space<vmem>>, %arg7: memref<2x128xf32, #tpu.memory_space<vmem>>) attributes {dimension_semantics = [#tpu.dimension_semantics<parallel>], iteration_bounds = array<i64: 1>, scalar_prefetch = 0 : i64, scratch_operands = 0 : i64, tpu.core_type = #tpu.core_type<tc>, window_params = [{pipeline_mode = #tpu.pipeline_mode<synchronous>, transform_indices = @transform_0, window_bounds = array<i64: 16, 16>}, {transform_indices = @transform_1, window_bounds = array<i64: 16, 16>}, {pipeline_mode = #tpu.pipeline_mode<synchronous>, transform_indices = @transform_2, window_bounds = array<i64: 8, 32>}, {pipeline_mode = #tpu.pipeline_mode<synchronous>, transform_indices = @transform_3, window_bounds = array<i64: 1, 32>}, {pipeline_mode = #tpu.pipeline_mode<synchronous>, transform_indices = @transform_4, window_bounds = array<i64: 32, 128>}, {pipeline_mode = #tpu.pipeline_mode<synchronous>, transform_indices = @transform_5, window_bounds = array<i64: 1, 128>}, {transform_indices = @transform_6, window_bounds = array<i64: 2, 128>}]} {
    %c0 = arith.constant 0 : index
    %c0_0 = arith.constant 0 : index
    %0 = vector.load %arg1[%c0, %c0_0] : memref<16x16xf32, #tpu.memory_space<vmem>>, vector<16x16xf32>
    %1 = math.absf %0 : vector<16x16xf32>
    %cst = arith.constant dense<0.000000e+00> : vector<16xf32>
    %2 = vector.multi_reduction <add>, %1, %cst [1] : vector<16x16xf32> to vector<16xf32>
    %3 = vector.shape_cast %2 : vector<16xf32> to vector<16x1xf32>
    %cst_1 = arith.constant dense<0.000000e+00> : vector<16xf32>
    %4 = vector.multi_reduction <add>, %1, %cst_1 [0] : vector<16x16xf32> to vector<16xf32>
    %5 = vector.shape_cast %4 : vector<16xf32> to vector<1x16xf32>
    %cst_2 = arith.constant 0.000000e+00 : f32
    %6 = vector.broadcast %cst_2 : f32 to vector<16x1xf32>
    %7 = arith.cmpf ogt, %3, %6 : vector<16x1xf32>
    %8 = math.rsqrt %3 : vector<16x1xf32>
    %cst_3 = arith.constant 0.000000e+00 : f32
    %9 = vector.broadcast %cst_3 : f32 to vector<16x1xf32>
    %10 = arith.select %7, %8, %9 : vector<16x1xi1>, vector<16x1xf32>
    %cst_4 = arith.constant 0.000000e+00 : f32
    %11 = vector.broadcast %cst_4 : f32 to vector<1x16xf32>
    %12 = arith.cmpf ogt, %5, %11 : vector<1x16xf32>
    %13 = math.rsqrt %5 : vector<1x16xf32>
    %cst_5 = arith.constant 0.000000e+00 : f32
    %14 = vector.broadcast %cst_5 : f32 to vector<1x16xf32>
    %15 = arith.select %12, %13, %14 : vector<1x16xi1>, vector<1x16xf32>
    %16 = vector.broadcast %10 : vector<16x1xf32> to vector<16x16xf32>
    %17 = arith.mulf %16, %0 : vector<16x16xf32>
    %18 = vector.broadcast %15 : vector<1x16xf32> to vector<16x16xf32>
    %19 = arith.mulf %17, %18 : vector<16x16xf32>
    %c0_6 = arith.constant 0 : index
    %c0_7 = arith.constant 0 : index
    %20 = vector.load %arg2[%c0_6, %c0_7] : memref<16x16xf32, #tpu.memory_space<vmem>>, vector<16x16xf32>
    %cst_8 = arith.constant dense<0.000000e+00> : vector<16x16xf32>
    %21 = tpu.matmul %19, %20, %cst_8 {dimension_numbers = #tpu.dot_dimension_numbers<[1], [0], [0], [1], [0, 0, 1, 1], [], []>} : vector<16x16xf32>, vector<16x16xf32>, vector<16x16xf32> -> vector<16x16xf32>
    %cst_9 = arith.constant dense<0.000000e+00> : vector<16x16xf32>
    %22 = tpu.matmul %19, %21, %cst_9 {dimension_numbers = #tpu.dot_dimension_numbers<[1], [0], [0], [1], [0, 0, 1, 1], [], []>} : vector<16x16xf32>, vector<16x16xf32>, vector<16x16xf32> -> vector<16x16xf32>
    %23 = vector.extract_strided_slice %22 {offsets = [0, 0], sizes = [16, 8], strides = [1, 1]} : vector<16x16xf32> to vector<16x8xf32>
    %24 = vector.extract_strided_slice %22 {offsets = [0, 8], sizes = [16, 8], strides = [1, 1]} : vector<16x16xf32> to vector<16x8xf32>
    %25 = tpu.concatenate %23, %24 in 0 : vector<16x8xf32>, vector<16x8xf32> -> vector<32x8xf32>
    %c0_10 = arith.constant 0 : index
    %c0_11 = arith.constant 0 : index
    %26 = vector.load %arg3[%c0_10, %c0_11] : memref<8x32xf32, #tpu.memory_space<vmem>>, vector<8x32xf32>
    %cst_12 = arith.constant dense<0.000000e+00> : vector<32x32xf32>
    %27 = tpu.matmul %25, %26, %cst_12 {dimension_numbers = #tpu.dot_dimension_numbers<[1], [0], [0], [1], [0, 0, 1, 1], [], []>} : vector<32x8xf32>, vector<8x32xf32>, vector<32x32xf32> -> vector<32x32xf32>
    %c0_13 = arith.constant 0 : index
    %c0_14 = arith.constant 0 : index
    %28 = vector.load %arg4[%c0_13, %c0_14] : memref<1x32xf32, #tpu.memory_space<vmem>>, vector<1x32xf32>
    %29 = vector.broadcast %28 : vector<1x32xf32> to vector<32x32xf32>
    %30 = arith.addf %27, %29 : vector<32x32xf32>
    %cst_15 = arith.constant 0.000000e+00 : f32
    %31 = vector.broadcast %cst_15 : f32 to vector<32x32xf32>
    %32 = arith.maximumf %30, %31 : vector<32x32xf32>
    %33 = vector.shape_cast %32 : vector<32x32xf32> to vector<2x16x32xf32>
    %cst_16 = arith.constant dense<0.000000e+00> : vector<2x32xf32>
    %34 = vector.multi_reduction <add>, %33, %cst_16 [1] : vector<2x16x32xf32> to vector<2x32xf32>
    %c0_17 = arith.constant 0 : index
    %c0_18 = arith.constant 0 : index
    %35 = vector.load %arg5[%c0_17, %c0_18] : memref<32x128xf32, #tpu.memory_space<vmem>>, vector<32x128xf32>
    %cst_19 = arith.constant dense<0.000000e+00> : vector<2x128xf32>
    %36 = tpu.matmul %34, %35, %cst_19 {dimension_numbers = #tpu.dot_dimension_numbers<[1], [0], [0], [1], [0, 0, 1, 1], [], []>} : vector<2x32xf32>, vector<32x128xf32>, vector<2x128xf32> -> vector<2x128xf32>
    %c0_20 = arith.constant 0 : index
    %c0_21 = arith.constant 0 : index
    %37 = vector.load %arg6[%c0_20, %c0_21] : memref<1x128xf32, #tpu.memory_space<vmem>>, vector<1x128xf32>
    %38 = vector.broadcast %37 : vector<1x128xf32> to vector<2x128xf32>
    %39 = arith.addf %36, %38 : vector<2x128xf32>
    %40 = tpu.iota {dimensions = array<i32: 1>} : vector<2x128xi32>
    %c2_i32 = arith.constant 2 : i32
    %41 = vector.broadcast %c2_i32 : i32 to vector<2x128xi32>
    %42 = arith.cmpi sge, %40, %41 : vector<2x128xi32>
    %c4_i32 = arith.constant 4 : i32
    %43 = vector.broadcast %c4_i32 : i32 to vector<2x128xi32>
    %44 = arith.cmpi slt, %40, %43 : vector<2x128xi32>
    %45 = arith.andi %42, %44 : vector<2x128xi1>
    %cst_22 = arith.constant 0xFF800000 : f32
    %46 = vector.broadcast %cst_22 : f32 to vector<2x128xf32>
    %47 = arith.select %45, %39, %46 : vector<2x128xi1>, vector<2x128xf32>
    %cst_23 = arith.constant dense<0xFF800000> : vector<2xf32>
    %48 = vector.multi_reduction <maximumf>, %47, %cst_23 [1] : vector<2x128xf32> to vector<2xf32>
    %49 = vector.shape_cast %48 : vector<2xf32> to vector<2x1xf32>
    %50 = vector.broadcast %49 : vector<2x1xf32> to vector<2x128xf32>
    %51 = arith.subf %39, %50 : vector<2x128xf32>
    %52 = math.exp %51 : vector<2x128xf32>
    %cst_24 = arith.constant 0.000000e+00 : f32
    %53 = vector.broadcast %cst_24 : f32 to vector<2x128xf32>
    %54 = arith.select %45, %52, %53 : vector<2x128xi1>, vector<2x128xf32>
    %cst_25 = arith.constant dense<0.000000e+00> : vector<2xf32>
    %55 = vector.multi_reduction <add>, %54, %cst_25 [1] : vector<2x128xf32> to vector<2xf32>
    %56 = vector.shape_cast %55 : vector<2xf32> to vector<2x1xf32>
    %57 = tpu.reciprocal %56 {approx = true} : vector<2x1xf32> -> vector<2x1xf32>
    %58 = vector.broadcast %57 : vector<2x1xf32> to vector<2x128xf32>
    %59 = arith.mulf %54, %58 : vector<2x128xf32>
    %60 = arith.select %45, %59, %39 : vector<2x128xi1>, vector<2x128xf32>
    %c0_26 = arith.constant 0 : index
    %c0_27 = arith.constant 0 : index
    %61 = vector.load %arg7[%c0_26, %c0_27] : memref<2x128xf32, #tpu.memory_space<vmem>>, vector<2x128xf32>
    tpu.vector_store %arg7[%c0_26, %c0_27], %60 {strides = array<i32>} : memref<2x128xf32, #tpu.memory_space<vmem>>, vector<2x128xf32>,
    return
  }
  func.func @transform_0(%arg0: i32) -> (i32, i32) {
    %c0_i32 = arith.constant 0 : i32
    %c0_i32_0 = arith.constant 0 : i32
    %c0_i32_1 = arith.constant 0 : i32
    return %c0_i32, %c0_i32_0 : i32, i32
  }
  func.func @transform_1(%arg0: i32) -> (i32, i32) {
    %c0_i32 = arith.constant 0 : i32
    %c0_i32_0 = arith.constant 0 : i32
    return %arg0, %c0_i32 : i32, i32
  }
  func.func @transform_2(%arg0: i32) -> (i32, i32) {
    %c0_i32 = arith.constant 0 : i32
    %c0_i32_0 = arith.constant 0 : i32
    %c0_i32_1 = arith.constant 0 : i32
    return %c0_i32, %c0_i32_0 : i32, i32
  }
  func.func @transform_3(%arg0: i32) -> (i32, i32) {
    %c0_i32 = arith.constant 0 : i32
    %c0_i32_0 = arith.constant 0 : i32
    %c0_i32_1 = arith.constant 0 : i32
    return %c0_i32, %c0_i32_0 : i32, i32
  }
  func.func @transform_4(%arg0: i32) -> (i32, i32) {
    %c0_i32 = arith.constant 0 : i32
    %c0_i32_0 = arith.constant 0 : i32
    %c0_i32_1 = arith.constant 0 : i32
    return %c0_i32, %c0_i32_0 : i32, i32
  }
  func.func @transform_5(%arg0: i32) -> (i32, i32) {
    %c0_i32 = arith.constant 0 : i32
    %c0_i32_0 = arith.constant 0 : i32
    %c0_i32_1 = arith.constant 0 : i32
    return %c0_i32, %c0_i32_0 : i32, i32
  }
  func.func @transform_6(%arg0: i32) -> (i32, i32) {
    %c0_i32 = arith.constant 0 : i32
    %c0_i32_0 = arith.constant 0 : i32
    return %arg0, %c0_i32 : i32, i32
  }
}

</mosaic_0001>

<bundles_post_ra>
// kernel: tpu_custom_call.1
= control target key start
LH: loop header
LB: loop body
LE: loop exit
PB: predicated region body
PF: predicated region fallthrough
CT: control target
= control target key end

     0   :  { %11 = vsyncpa [#allocation3], 0  ;;  %s893_s0 = inlined_call_operand.hbm [shape: f32[16,16], index: 0, kind: input, shape index: {}]   ;;  %s894_s1 = inlined_call_operand.hbm [shape: f32[16,16], index: 1, kind: input, shape index: {}]   ;;  %s895_s2 = inlined_call_operand.hbm [shape: f32[8,32], index: 2, kind: input, shape index: {}]   ;;  %s896_s3 = inlined_call_operand.vmem [shape: f32[1,32], index: 3, kind: input, shape index: {}]   ;;  %s897_s4 = inlined_call_operand.hbm [shape: f32[32,128], index: 4, kind: input, shape index: {}]   ;;  %s898_s5 = inlined_call_operand.vmem [shape: f32[1,128], index: 5, kind: input, shape index: {}]   ;;  %s899_s6 = inlined_call_operand.hbm [shape: f32[2,128], index: 6, kind: output, shape index: {}]  }
   0x1   :  { %12 = vsyncpa [#allocation6], 0 }
   0x2   :  { %13 = vsyncpa [#allocation9], 0 }
   0x3   :  { %14 = vsyncpa [#allocation4], 0  ;;  %s737_s21 = smov [#allocation5]   ;;  %s738_s23 = smov [#allocation2]  }
   0x4   :  { %s32_s22 = sshll.u32 %s737_s21, 4  ;;  %s20_s24 = sshll.u32 %s738_s23, 4  ;;  %s33_s22 = int_to_ptr.vmem [resolvable:$true] %s32_s22  ;;  %s783_s24 = int_to_ptr.vmem [resolvable:$true] %s20_s24 }
   0x5   :  { %s619_s27 = scalar_lea.hbm %s894_s1, 256 }
   0x6   :  { %p620_p0 = scmp.ne.s32.totalorder %s894_s1, %s619_s27  ;;  %p623_p1 = scmp.lt.u32.totalorder %s619_s27, %s894_s1 }
   0x8   :  { %p625_p2 = pnand %p623_p1, %p620_p0 }
   0xa   :  { %628 = shalt.err (!%p625_p2)
}
   0xb   :  { %s629_s8 = scalar_lea.vmem %s33_s22, 256  ;;  %p634_p4 = scmp.lt.s32.totalorder %s33_s22, %s33_s22 }
   0xc   :  { %p630_p3 = scmp.ne.s32.totalorder %s33_s22, %s629_s8  ;;  %p635_p5 = scmp.lt.s32.totalorder %s629_s8, %s629_s8 }
   0xe   :  { %p636_p6 = por %p635_p5, %p634_p4 }
  0x10   :  { %p637_p7 = pnand %p636_p6, %p630_p3 }
  0x12   :  { %640 = shalt.err (!%p637_p7)
}
  0x13   :  { %s739_s9 = smov 128   ;;  %s740_s10 = smov 8  }
  0x14   :  { %38 = dma.hbm_to_vmem [thread:$0]  %s894_s1, 256, %s33_s22, [#allocation6], %s739_s9, %s739_s9, %s740_s10  }
  0x15   :  { %s641_s15 = scalar_lea.hbm %s893_s0, 256 }
  0x16   :  { %p642_p8 = scmp.ne.s32.totalorder %s893_s0, %s641_s15  ;;  %p645_p9 = scmp.lt.u32.totalorder %s641_s15, %s893_s0 }
  0x18   :  { %p647_p10 = pnand %p645_p9, %p642_p8 }
  0x1a   :  { %650 = shalt.err (!%p647_p10)
}
  0x1b   :  { %s651_s20 = scalar_lea.vmem %s783_s24, 256  ;;  %p656_p12 = scmp.lt.s32.totalorder %s783_s24, %s783_s24 }
  0x1c   :  { %p652_p11 = scmp.ne.s32.totalorder %s783_s24, %s651_s20  ;;  %p657_p13 = scmp.lt.s32.totalorder %s651_s20, %s651_s20 }
  0x1e   :  { %p658_p0 = por %p657_p13, %p656_p12 }
  0x20   :  { %p659_p1 = pnand %p658_p0, %p652_p11 }
  0x22   :  { %662 = shalt.err (!%p659_p1)
}
  0x23   :  { %26 = dma.hbm_to_vmem [thread:$0]  %s893_s0, 256, %s783_s24, [#allocation3], %s739_s9, %s739_s9, %s740_s10  }
  0x24   :  { %s741_s22 = smov [#allocation7]   ;;  %s742_s25 = smov [#allocation8]  }
  0x25   :  { %s45_s23 = sshll.u32 %s741_s22, 4  ;;  %s56_s26 = sshll.u32 %s742_s25, 4  ;;  %s46_s23 = int_to_ptr.vmem [resolvable:$true] %s45_s23  ;;  %s820_s26 = int_to_ptr.vmem [resolvable:$true] %s56_s26 }
  0x26   :  { %s663_s29 = scalar_lea.hbm %s895_s2, 128 }
  0x27   :  { %p664_p2 = scmp.ne.s32.totalorder %s895_s2, %s663_s29  ;;  %p667_p3 = scmp.lt.u32.totalorder %s663_s29, %s895_s2 }
  0x29   :  { %p669_p4 = pnand %p667_p3, %p664_p2 }
  0x2b   :  { %672 = shalt.err (!%p669_p4)
}
  0x2c   :  { %s673_s0 = scalar_lea.vmem %s46_s23, 128  ;;  %p678_p6 = scmp.lt.s32.totalorder %s46_s23, %s46_s23 }
  0x2d   :  { %p674_p5 = scmp.ne.s32.totalorder %s46_s23, %s673_s0  ;;  %p679_p7 = scmp.lt.s32.totalorder %s673_s0, %s673_s0 }
  0x2f   :  { %p680_p8 = por %p679_p7, %p678_p6 }
  0x31   :  { %p681_p9 = pnand %p680_p8, %p674_p5 }
  0x33   :  { %684 = shalt.err (!%p681_p9)
}
  0x34   :  { %48 = dma.hbm_to_vmem [thread:$0]  %s895_s2, 128, %s46_s23, [#allocation6]  }
  0x35   :  { %s685_s15 = scalar_lea.hbm %s897_s4, 512 }
  0x36   :  { %p686_p10 = scmp.ne.s32.totalorder %s897_s4, %s685_s15  ;;  %p689_p11 = scmp.lt.u32.totalorder %s685_s15, %s897_s4 }
  0x38   :  { %p691_p12 = pnand %p689_p11, %p686_p10 }
  0x3a   :  { %694 = shalt.err (!%p691_p12)
}
  0x3b   :  { %s695_s20 = scalar_lea.vmem %s820_s26, 512  ;;  %p700_p0 = scmp.lt.s32.totalorder %s820_s26, %s820_s26 }
  0x3c   :  { %p696_p13 = scmp.ne.s32.totalorder %s820_s26, %s695_s20  ;;  %p701_p1 = scmp.lt.s32.totalorder %s695_s20, %s695_s20 }
  0x3e   :  { %p702_p2 = por %p701_p1, %p700_p0 }
  0x40   :  { %p703_p3 = pnand %p702_p2, %p696_p13 }
  0x42   :  { %706 = shalt.err (!%p703_p3)
}
  0x43   :  { %62 = dma.hbm_to_vmem [thread:$0]  %s897_s4, 512, %s820_s26, [#allocation9], %s739_s9, %s739_s9, %s740_s10  }
  0x44   :  { %729 = dma.done.wait [#allocation3], 256  }
  0x45   :  { %730 = vsyncadd [#allocation3], 4294967040 }
  0x46   :  { %731 = dma.done.wait [#allocation6], 384  }
  0x47   :  { %732 = vsyncadd [#allocation6], 4294966912 }
  0x48   :  { %733 = dma.done.wait [#allocation9], 512  }
  0x49   :  { %734 = vsyncadd [#allocation9], 4294966784  ;;  %v77_v0 = vld [vmem:[#allocation2] sm:$0xff]  ;;  %vm81_vm0 = vcmask 130048   ;;  %v78_v1 = vld [vmem:[#allocation2 + $0x8] sm:$0xff]  ;;  %vm280_vm4 = vcmask 64512  }
  0x4a   :  { %v79_v2 = vand.u32 2147483647, %v77_v0  ;;  %v80_v3 = vand.u32 2147483647, %v78_v1  ;;  %v108_v7 = vld [vmem:[#allocation5] sm:$0xff]  ;;  %v109_v8 = vld [vmem:[#allocation5 + $0x8] sm:$0xff] }
  0x4b   :  { %v584_v9 = vpack.c.bf16 %v109_v8, %v108_v7  ;;  %v272_v31 = vld [vmem:[#allocation7] sm:$0xff]  ;;  %s743_s4 = smov 120   ;;  %vm378_vm5 = vcmask 261120   ;;  %v397_v41 = vld [vmem:[#allocation8] sm:$0xff]  ;;  %v398_v42 = vld [vmem:[#allocation8 + $0x8] sm:$0xff]  ;;  %v744_v46 = vmov 0.0|0.0  }
  0x4c   :  { %v82_v4 = vsel %vm81_vm0, %v79_v2, 0.0  ;;  %v85_v5 = vsel %vm81_vm0, %v80_v3, 0.0  ;;  %v526_v36 = vld [vmem:[%s896_s3] ss:$0 sm:$0xff]  ;;  %v593_v44 = vpack.c.bf16 %v398_v42, %v397_v41  ;;  %v399_v49 = vld [vmem:[#allocation8 + $0x10] sm:$0xff]  ;;  %vm745_vm6 = vmmov 0  }
  0x4d   :  { %83 = vadd.xlane.f32.xlu0 %v82_v4  ;;  %v88_v6 = vadd.f32 %v85_v5, %v82_v4  ;;  %585 = vmatprep.subr.bf16.mxu0 %v584_v9  ;;  %v400_v50 = vld [vmem:[#allocation8 + $0x18] sm:$0xff]  ;;  %v746_v53 = vmov 0.0   ;;  %vm410_vm7 = vcmask 1041409   ;;  %vm490_vm11 = vcmask 1041408  }
  0x4e   :  { %587 = vmatpush3.bf16.msra.mxu0 %v584_v9  ;;  %v596_v52 = vpack.c.bf16 %v400_v50, %v399_v49 }
  0x4f   :  { %v89_v10 = vrot.slane %v88_v6, 4  ;;  %565 = vmatprep.subr.mxu0 %v272_v31 }
  0x51   :  { %86 = vadd.xlane.f32.xlu0 %v85_v5  ;;  %v90_v11 = vadd.f32 %v89_v10, %v88_v6 }
  0x53   :  { %v91_v12 = vrot.slane %v90_v11, 2 }
  0x55   :  { %v92_v13 = vadd.f32 %v91_v12, %v90_v11  ;;  %v484_v12 = vlaneseq }
  0x57   :  { %v93_v14 = vrot.slane %v92_v13, 1 }
  0x59   :  { %v94_v15 = vadd.f32 %v93_v14, %v92_v13  ;;  %v485_v13 = vand.u32 127, %v484_v12  ;;  %v531_v14 = vld [vmem:[%s898_s5] ss:$0 sm:$0xff]  ;;  %s747_s5 = smov [#allocation10]  }
  0x5a   :  { %s511_s22 = sshll.u32 %s747_s5, 4  ;;  %s512_s22 = int_to_ptr.vmem [resolvable:$true] %s511_s22 }
  0x5b   :  { %609 = vrsqrt.f32 %v94_v15  ;;  %vm101_vm1 = vcmp.gt.f32.partialorder %v94_v15, 0.0  ;;  %vm486_vm8 = vcmp.ge.s32.totalorder %v485_v13, 2  ;;  %vm487_vm9 = vcmp.lt.s32.totalorder %v485_v13, 4  ;;  %s707_s23 = scalar_lea.vmem %s512_s22, 32  ;;  %p712_p5 = scmp.lt.s32.totalorder %s512_s22, %s512_s22 }
  0x5c   :  { %vm871_vm10 = vmand %vm486_vm8, %vm487_vm9  ;;  %p708_p4 = scmp.ne.s32.totalorder %s512_s22, %s707_s23  ;;  %p713_p6 = scmp.lt.s32.totalorder %s707_s23, %s707_s23 }
  0x5e   :  { %p714_p7 = por %p713_p6, %p712_p5 }
  0x60   :  { %p715_p8 = pnand %p714_p7, %p708_p4 }
  0x65   :  { %v610_v18 = vpop.eup %609 }
  0x66   :  { %v103_v21 = vsel %vm101_vm1, %v610_v18, 0.0 }
  0xda   :  { %v84_v16 = vpop.xlane.xlu0 %83 }
  0xdb   :  { %611 = vrsqrt.f32 %v84_v16  ;;  %vm95_vm2 = vcmp.gt.f32.partialorder %v84_v16, 0.0 }
  0xde   :  { %v87_v17 = vpop.xlane.xlu0 %86 }
  0xdf   :  { %613 = vrsqrt.f32 %v87_v17  ;;  %vm96_vm3 = vcmp.gt.f32.partialorder %v87_v17, 0.0 }
  0xe5   :  { %v612_v19 = vpop.eup %611 }
  0xe6   :  { %v99_v20 = vsel %vm95_vm2, %v612_v19, 0.0 }
  0xe7   :  { %v104_v22 = vmul.f32 %v99_v20, %v77_v0 }
  0xe9   :  { %v614_v23 = vpop.eup %613  ;;  %v106_v24 = vmul.f32 %v104_v22, %v103_v21 }
  0xea   :  { %v100_v25 = vsel %vm96_vm3, %v614_v23, 0.0 }
  0xeb   :  { %v105_v26 = vmul.f32 %v100_v25, %v78_v1  ;;  %555 = vmatprep.mubr.msk.f32.mxu0 %vm81_vm0, %v106_v24  ;;  %562 = vmatprep.mubr.msk.f32.mxu1 %vm81_vm0, %v106_v24 }
  0xed   :  { %v107_v27 = vmul.f32 %v105_v26, %v103_v21 }
  0xef   :  { %556 = vmatmul.mubr.msk.f32.vlgmr.msra.gmra.mrb[0].mxu0 %vm81_vm0, %v107_v27 }
  0xf0   :  { %566 = vmatpush3.msra.mxu0 %v272_v31 }
 0x1c2   :  { %v557_v28 = vpop.f32.mrb[0].mxu0 }
 0x1c3   :  { %v182_v29 = vpop.f32.mrb[1].mxu0 }
 0x1c4   :  { %v588_v30 = vpack.c.bf16 %v557_v28, %v182_v29 }
 0x1c6   :  { %589 = vmatprep.subr.bf16.mxu1 %v588_v30 }
 0x1c7   :  { %591 = vmatpush3.bf16.msra.mxu1 %v588_v30 }
 0x1c8   :  { %592 = vmatprep.subr.bf16.mxu1 %v744_v46 }
 0x1ca   :  { %563 = vmatmul.mubr.msk.f32.vlgmr.msra.gmra.mrb[0].mxu1 %vm81_vm0, %v107_v27 }
 0x1cb   :  { %594 = vmatpush3.bf16.msra.mxu1 %v593_v44  ;;  %581 = vmatprep.mubr.msk.f32.mxu1 %vm745_vm6, %v746_v53 }
 0x1cc   :  { %595 = vmatprep.subr.bf16.mxu1 %v744_v46 }
 0x1cf   :  { %597 = vmatpush3.bf16.msra.mxu1 %v596_v52 }
 0x29d   :  { %v564_v32 = vpop.f32.mrb[0].mxu1 }
 0x29e   :  { %v257_v33 = vpop.f32.mrb[1].mxu1 }
 0x29f   :  { %268 = vrot.lane.b32.xlu1 %v257_v33, %s743_s4  ;;  %567 = vmatprep.mubr.msk.f32.mxu0 %vm280_vm4, %v257_v33 }
 0x2a0   :  { %568 = vmatmul.mubr.msk.f32.vlgmr.msra.gmra.mrb[2].mxu0 %vm280_vm4, %v564_v32 }
 0x2a3   :  { %270 = vrot.lane.b32.xlu1 %v564_v32, %s743_s4 }
 0x311   :  { %v269_v34 = vpop.permute.xlu1 %268 }
 0x312   :  { %570 = vmatprep.mubr.msk.f32.mxu0 %vm280_vm4, %v269_v34 }
 0x315   :  { %v271_v35 = vpop.permute.xlu1 %270 }
 0x316   :  { %571 = vmatmul.mubr.msk.f32.gmra.mrb[4].mxu0 %vm280_vm4, %v271_v35 }
 0x373   :  { %v569_v37 = vpop.f32.mrb[2].mxu0 }
 0x374   :  { %v361_v38 = vadd.f32 %v569_v37, %v526_v36  ;;  %v355_v39 = vpop.f32.mrb[3].mxu0 }
 0x375   :  { %v356_v40 = vadd.f32 %v526_v36, %v355_v39 }
 0x376   :  { %v375_v43 = vmax.f32 %v361_v38, 0.0 }
 0x377   :  { %v374_v45 = vmax.f32 %v356_v40, 0.0 }
 0x378   :  { %v380_v47 = vsel %vm378_vm5, %v375_v43, 0.0 }
 0x379   :  { %v379_v48 = vsel %vm378_vm5, %v374_v45, 0.0 }
 0x37a   :  { %v381_v51 = vadd.f32 %v380_v47, %v379_v48 }
 0x37c   :  { %v382_v54 = vrot.slane %v381_v51, 4 }
 0x37e   :  { %v383_v59 = vadd.f32 %v382_v54, %v381_v51 }
 0x380   :  { %v384_v0 = vrot.slane %v383_v59, 2 }
 0x382   :  { %v385_v3 = vadd.f32 %v384_v0, %v383_v59 }
 0x384   :  { %v386_v6 = vrot.slane %v385_v3, 1 }
 0x386   :  { %v387_v9 = vadd.f32 %v386_v6, %v385_v3 }
 0x3e9   :  { %v572_v55 = vpop.f32.mrb[4].mxu0 }
 0x3ea   :  { %v371_v56 = vadd.f32 %v572_v55, %v526_v36  ;;  %v365_v57 = vpop.f32.mrb[5].mxu0 }
 0x3eb   :  { %v366_v58 = vadd.f32 %v526_v36, %v365_v57 }
 0x3ec   :  { %v377_v60 = vmax.f32 %v371_v56, 0.0 }
 0x3ed   :  { %v376_v61 = vmax.f32 %v366_v58, 0.0 }
 0x3ee   :  { %v389_v62 = vsel %vm378_vm5, %v377_v60, 0.0 }
 0x3ef   :  { %v388_v63 = vsel %vm378_vm5, %v376_v61, 0.0 }
 0x3f0   :  { %v390_v1 = vadd.f32 %v389_v62, %v388_v63 }
 0x3f2   :  { %v391_v2 = vrot.slane %v390_v1, 4 }
 0x3f4   :  { %v392_v4 = vadd.f32 %v391_v2, %v390_v1 }
 0x3f6   :  { %v393_v5 = vrot.slane %v392_v4, 2 }
 0x3f8   :  { %v394_v7 = vadd.f32 %v393_v5, %v392_v4 }
 0x3fa   :  { %v395_v8 = vrot.slane %v394_v7, 1 }
 0x3fc   :  { %v396_v10 = vadd.f32 %v395_v8, %v394_v7 }
 0x3fe   :  { %v411_v11 = vsel %vm410_vm7, %v396_v10, %v387_v9 }
 0x3ff   :  { %582 = vmatmul.mubr.msk.f32.vlgmr.msra.gmra.mrb[2].mxu1 %vm378_vm5, %v411_v11 }
 0x4d2   :  { %v480_v15 = vpop.f32.mrb[2].mxu1 }
 0x4d3   :  { %v481_v17 = vadd.f32 %v531_v14, %v480_v15  ;;  %v583_v18 = vpop.f32.mrb[3].mxu1 }
 0x4d5   :  { %v489_v19 = vsel %vm871_vm10, %v481_v17, -inf }
 0x4d6   :  { %v491_v20 = vsel %vm490_vm11, %v489_v19, -inf }
 0x4d7   :  { %492 = vmax.xlane.f32.xlu0 %v491_v20 }
 0x564   :  { %v493_v21 = vpop.xlane.xlu0 %492 }
 0x565   :  { %v494_v22 = vsub.f32 %v481_v17, %v493_v21 }
 0x567   :  { %v495_v23 = vmul.f32 1.442695, %v494_v22 }
 0x569   :  { %615 = vpow2.f32 %v495_v23 }
 0x573   :  { %v616_v24 = vpop.eup %615 }
 0x574   :  { %v497_v25 = vsel %vm871_vm10, %v616_v24, 0.0 }
 0x575   :  { %v498_v26 = vsel %vm490_vm11, %v497_v25, 0.0 }
 0x576   :  { %499 = vadd.xlane.f32.xlu1 %v498_v26 }
 0x603   :  { %v500_v27 = vpop.xlane.xlu1 %499 }
 0x604   :  { %617 = vrcp.f32 %v500_v27 }
 0x60e   :  { %v618_v28 = vpop.eup %617 }
 0x60f   :  { %v502_v29 = vmul.f32 %v618_v28, %v497_v25 }
 0x611   :  { %v503_v30 = vsel %vm871_vm10, %v502_v29, %v481_v17 }
 0x612   :  { %504 = vst [vmem:[#allocation10] sm:$0x3] %v503_v30 }
 0x613   :  { %718 = shalt.err (!%p715_p8)
}
 0x614   :  { %s719_s27 = scalar_lea.hbm %s899_s6, 32 }
 0x615   :  { %p720_p9 = scmp.ne.s32.totalorder %s899_s6, %s719_s27  ;;  %p723_p10 = scmp.lt.u32.totalorder %s719_s27, %s899_s6 }
 0x617   :  { %p725_p11 = pnand %p723_p10, %p720_p9 }
 0x619   :  { %728 = shalt.err (!%p725_p11)
}
 0x61a   :  { %514 = dma.vmem_to_hbm [thread:$0]  %s512_s22, 32, %s899_s6, [#allocation4]  }
 0x61b   :  { %735 = dma.done.wait [#allocation4], 32  }
 0x61c   :  { %736 = vsyncadd [#allocation4], 4294967264 }
 0x61d   :  { %518 = vsyncpa [#allocation3], 1 }
 0x61e   :  { %519 = vsyncpa [#allocation6], 1 }
 0x61f   :  { %520 = vsyncpa [#allocation9], 1 }
 0x620   :  { %521 = vsyncpa [#allocation4], 1 }

</bundles_post_ra>
